<compile_context>
chip_gen: v6e
topology: v6e:2x2x1
jax: 0.10.0
libtpu: 0.0.40
codegen_flags: <defaults>
</compile_context>

<pallas_src>
import functools
import math

import jax
import jax.numpy as jnp
from jax.experimental import pallas as pl
from jax.experimental.pallas import tpu as pltpu


def _round_up(a, b):
    return ((a + b - 1) // b) * b


def _lr_kernel(xin_ref, w1_ref, w2_ref, w3_ref, b_ref, o_ref):
    """One batch tile, feature-major.

    xin_ref : (n_in_p + n_aug_p, TM)  packed [x_T ; aug_T], compute dtype
    w1_ref  : (h0, n_in_p)            linear1.weight (zero-padded input cols)
    w2_ref  : (h1, h0 + n_aug_p)      linear2.weight (zero-padded aug cols)
    w3_ref  : (n_out, h1)             linear3.weight
    b_ref   : (hmax, 3)               [b1 | b2 | b3] columns, zero-padded, f32
    o_ref   : (n_out, TM)             y_T (f32, lane-dense)
    """
    h0, n_in_p = w1_ref.shape
    h1_dim = w2_ref.shape[0]
    n_out = w3_ref.shape[0]
    cdt = w1_ref.dtype  # matmul-input dtype (f32 or bf16); accumulation is f32.

    xin = xin_ref[...]                      # (n_feat, TM)
    x_t = xin[:n_in_p, :]                   # (n_in_p, TM)   sublane-aligned slice
    aug_t = xin[n_in_p:, :]                 # (n_aug_p, TM)  sublane-aligned slice

    b = b_ref[...]
    b1 = b[:h0, 0:1]                        # (h0, 1)   lane-broadcast columns
    b2 = b[:h1_dim, 1:2]                    # (h1, 1)
    b3 = b[:n_out, 2:3]                     # (n_out, 1)

    # linear1 + relu:  h1_T = relu(W1 @ x_T + b1)
    h1_t = jnp.dot(w1_ref[...], x_t, preferred_element_type=jnp.float32)
    h1_t = jnp.maximum(h1_t + b1, 0.0)

    # linear2 on concat([h1, aug]) as an exact split matmul, + relu:
    #   W2 @ cat_T == W2[:, :h0] @ h1_T + W2[:, h0:] @ aug_T
    w2 = w2_ref[...]
    h2_t = (jnp.dot(w2[:, :h0], h1_t.astype(cdt),
                    preferred_element_type=jnp.float32)
            + jnp.dot(w2[:, h0:], aug_t,
                      preferred_element_type=jnp.float32)
            + b2)
    h2_t = jnp.maximum(h2_t, 0.0)

    # linear3:  y_T = W3 @ h2_T + b3   (lane-dense store, no transpose needed)
    y_t = jnp.dot(w3_ref[...], h2_t.astype(cdt),
                  preferred_element_type=jnp.float32) + b3
    o_ref[...] = y_t.astype(o_ref.dtype)


def pack_lr_params(params, compute_dtype=jnp.float32):
    """One-time weight preprocessing; hoist out of meta-learning inner loops."""
    w1 = params['mlp.linear1.weight']      # (h0, n_in)
    b1 = params['mlp.linear1.bias']        # (h0,)
    w2 = params['mlp.linear2.weight']      # (h1, h0 + n_aug)
    b2 = params['mlp.linear2.bias']        # (h1,)
    w3 = params['mlp.linear3.weight']      # (n_out, h1)
    b3 = params['mlp.linear3.bias']        # (n_out,)
    h0, n_in = w1.shape
    h1 = w2.shape[0]
    n_aug = w2.shape[1] - h0
    n_out = w3.shape[0]

    n_in_p = _round_up(n_in, 8)            # sublane-align the in-kernel x/aug split
    n_aug_p = _round_up(n_aug, 8)
    hmax = max(h0, h1, n_out)

    w1p = jnp.pad(w1, ((0, 0), (0, n_in_p - n_in))).astype(compute_dtype)
    w2p = jnp.pad(w2, ((0, 0), (0, n_aug_p - n_aug))).astype(compute_dtype)
    bias = jnp.zeros((hmax, 3), jnp.float32)
    bias = bias.at[:h0, 0].set(b1.astype(jnp.float32))
    bias = bias.at[:h1, 1].set(b2.astype(jnp.float32))
    bias = bias.at[:n_out, 2].set(b3.astype(jnp.float32))
    return dict(w1=w1p, w2=w2p, w3=w3.astype(compute_dtype), bias=bias)


def lr_forward_packed(x, aug, packed, *, target_tiles=2, max_block_cols=4096,
                      interpret=False):
    n, n_in = x.shape
    n_aug = aug.shape[1]
    w1, w2, w3, bias = packed['w1'], packed['w2'], packed['w3'], packed['bias']
    cdt = w1.dtype
    h0, n_in_p = w1.shape
    h1 = w2.shape[0]
    n_aug_p = w2.shape[1] - h0
    n_out = w3.shape[0]
    hmax = bias.shape[0]
    n_feat = n_in_p + n_aug_p

    # Batch tile on the LANE axis: aim for `target_tiles` grid steps (>=2 lets
    # ("parallel",) split tiles across v7x's two TensorCores; 1 big tile is fine
    # on single-TC v5e/v6e), capped so per-step VMEM stays tiny.
    tm = max(128, _round_up(pl.cdiv(n, target_tiles), 128))
    tm = min(tm, max(128, _round_up(max_block_cols, 128)))
    n_pad = _round_up(n, tm)
    grid = (n_pad // tm,)

    # Single fused streamed input: [x | zero-pad | aug | zero-pad], transposed
    # to feature-major. Padded feature rows meet zero weight columns -> exact.
    parts = [x.astype(cdt)]
    if n_in_p > n_in:
        parts.append(jnp.zeros((n, n_in_p - n_in), cdt))
    parts.append(aug.astype(cdt))
    if n_aug_p > n_aug:
        parts.append(jnp.zeros((n, n_aug_p - n_aug), cdt))
    xin = jnp.concatenate(parts, axis=1).T              # (n_feat, n)
    if n_pad != n:
        # Pads at most (tm-1) extra columns; padded columns are row/column
        # independent and sliced off below.
        xin = jnp.pad(xin, ((0, 0), (0, n_pad - n)))

    resident = lambda shape: pl.BlockSpec(shape, lambda i: (0, 0))
    out_t = pl.pallas_call(
        _lr_kernel,
        out_shape=jax.ShapeDtypeStruct((n_out, n_pad), jnp.float32),
        grid=grid,
        in_specs=[
            pl.BlockSpec((n_feat, tm), lambda i: (0, i)),  # streamed input
            resident((h0, n_in_p)),                        # W1       (resident)
            resident((h1, h0 + n_aug_p)),                  # W2 whole (resident)
            resident((n_out, h1)),                         # W3       (resident)
            resident((hmax, 3)),                           # packed biases
        ],
        out_specs=pl.BlockSpec((n_out, tm), lambda i: (0, i)),
        compiler_params=pltpu.CompilerParams(
            dimension_semantics=("parallel",)),
        interpret=interpret,
    )(xin, w1, w2, w3, bias)

    # (n_out, N) -> (N, n_out); a free reshape when n_out == 1.
    return out_t[:, :n].T


def lr_forward(x, aug, params, *, compute_dtype=jnp.float32, target_tiles=2,
               max_block_cols=4096, min_pallas_rows=256, interpret=False):
    # Small-batch fallback: pallas_call launch overhead loses to fused XLA.
    if x.shape[0] < min_pallas_rows:
        return lr_reference(x, aug, params)
    packed = pack_lr_params(params, compute_dtype=compute_dtype)
    return lr_forward_packed(x, aug, packed, target_tiles=target_tiles,
                             max_block_cols=max_block_cols, interpret=interpret)


def init_lr_params(key, n_input, n_h, n_output, n_out_aug):
    """Deterministic kaiming_normal_(mode='fan_in') init, biases = 0."""
    shapes = [
        ('mlp.linear1', (n_h[0], n_input)),
        ('mlp.linear2', (n_h[1], n_h[0] + n_out_aug)),
        ('mlp.linear3', (n_output, n_h[1])),
    ]
    params = {}
    for name, (fan_out, fan_in) in shapes:
        key, sub = jax.random.split(key)
        std = math.sqrt(2.0 / fan_in)  # gain sqrt(2) / sqrt(fan_in)
        params[name + '.weight'] = std * jax.random.normal(
            sub, (fan_out, fan_in), dtype=jnp.float32)
        params[name + '.bias'] = jnp.zeros((fan_out,), dtype=jnp.float32)
    return params


def lr_reference(x, aug, params):
    """Pure-JAX reference matching the PyTorch forward exactly."""
    h = jnp.maximum(x @ params['mlp.linear1.weight'].T
                    + params['mlp.linear1.bias'], 0.0)
    cat = jnp.concatenate([h, aug], axis=-1)
    h2 = jnp.maximum(cat @ params['mlp.linear2.weight'].T
                     + params['mlp.linear2.bias'], 0.0)
    return h2 @ params['mlp.linear3.weight'].T + params['mlp.linear3.bias']


if __name__ == "__main__":
    key = jax.random.PRNGKey(0)
    # Small shapes consistent with the regression meta-learning setup.
    n_input, n_h, n_output, n_out_aug = 4, [32, 32], 1, 8
    batch = 8

    kp, kx, ka = jax.random.split(key, 3)
    params = init_lr_params(kp, n_input, n_h, n_output, n_out_aug)
    x = jax.random.normal(kx, (batch, n_input), dtype=jnp.float32)
    aug = jax.random.normal(ka, (batch, n_out_aug), dtype=jnp.float32)
    y_ref = lr_reference(x, aug, params)

    # Tolerances cover MXU default-precision (bf16-pass) differences between
    # the Mosaic kernel and the XLA reference across TPU generations; genuine
    # layout/slicing bugs would produce O(1) errors and still be caught.
    TOL_F32 = dict(atol=5e-2, rtol=5e-2)
    TOL_BF16 = dict(atol=2e-1, rtol=2e-1)

    # 1) Small batch forced through the Pallas kernel (single 128-lane tile).
    fwd_small = jax.jit(functools.partial(lr_forward, min_pallas_rows=0))
    y = fwd_small(x, aug, params)
    jax.block_until_ready(y)
    assert y.shape == (batch, n_output)
    assert jnp.allclose(y, y_ref, **TOL_F32), "small-batch kernel mismatch"

    # 2) Default path: tiny batches fall back to fused XLA (same numerics).
    y_fb = jax.jit(lr_forward)(x, aug, params)
    jax.block_until_ready(y_fb)
    assert jnp.allclose(y_fb, y_ref, **TOL_F32), "fallback mismatch"

    # 3) Larger batch: two pipelined tiles ("parallel" -> both v7x TCs).
    big = 1024
    kx2, ka2 = jax.random.split(jax.random.PRNGKey(1))
    xb = jax.random.normal(kx2, (big, n_input), dtype=jnp.float32)
    augb = jax.random.normal(ka2, (big, n_out_aug), dtype=jnp.float32)
    yb_ref = lr_reference(xb, augb, params)
    yb = jax.jit(lr_forward)(xb, augb, params)
    jax.block_until_ready(yb)
    assert yb.shape == (big, n_output)
    assert jnp.allclose(yb, yb_ref, **TOL_F32), "tiled kernel mismatch"

    # 4) bf16 streaming path (MXU-native on v5e/v6e/v7x); accumulation stays f32.
    fwd_bf16 = jax.jit(functools.partial(lr_forward,
                                         compute_dtype=jnp.bfloat16))
    yb16 = fwd_bf16(xb, augb, params)
    jax.block_until_ready(yb16)
    assert jnp.allclose(yb16, yb_ref, **TOL_BF16), "bf16 kernel mismatch"

    print("KERNEL_OK")
</pallas_src>

<mosaic_0001>
module attributes {stable_mosaic.version = 11 : i64} {
  func.func @_lr_kernel(%arg0: i32, %arg1: memref<16x128xf32, #tpu.memory_space<vmem>>, %arg2: memref<32x8xf32, #tpu.memory_space<vmem>>, %arg3: memref<32x40xf32, #tpu.memory_space<vmem>>, %arg4: memref<1x32xf32, #tpu.memory_space<vmem>>, %arg5: memref<32x3xf32, #tpu.memory_space<vmem>>, %arg6: memref<1x128xf32, #tpu.memory_space<vmem>>) attributes {dimension_semantics = [#tpu.dimension_semantics<parallel>], iteration_bounds = array<i64: 1>, scalar_prefetch = 0 : i64, scratch_operands = 0 : i64, tpu.core_type = #tpu.core_type<tc>, window_params = [{transform_indices = @transform_0, window_bounds = array<i64: 16, 128>}, {pipeline_mode = #tpu.pipeline_mode<synchronous>, transform_indices = @transform_1, window_bounds = array<i64: 32, 8>}, {pipeline_mode = #tpu.pipeline_mode<synchronous>, transform_indices = @transform_2, window_bounds = array<i64: 32, 40>}, {pipeline_mode = #tpu.pipeline_mode<synchronous>, transform_indices = @transform_3, window_bounds = array<i64: 1, 32>}, {pipeline_mode = #tpu.pipeline_mode<synchronous>, transform_indices = @transform_4, window_bounds = array<i64: 32, 3>}, {transform_indices = @transform_5, window_bounds = array<i64: 1, 128>}]} {
    %c0 = arith.constant 0 : index
    %c0_0 = arith.constant 0 : index
    %0 = vector.load %arg1[%c0, %c0_0] : memref<16x128xf32, #tpu.memory_space<vmem>>, vector<16x128xf32>
    %1 = vector.extract_strided_slice %0 {offsets = [0, 0], sizes = [8, 128], strides = [1, 1]} : vector<16x128xf32> to vector<8x128xf32>
    %2 = vector.extract_strided_slice %0 {offsets = [8, 0], sizes = [8, 128], strides = [1, 1]} : vector<16x128xf32> to vector<8x128xf32>
    %c0_1 = arith.constant 0 : index
    %c0_2 = arith.constant 0 : index
    %3 = vector.load %arg5[%c0_1, %c0_2] : memref<32x3xf32, #tpu.memory_space<vmem>>, vector<32x3xf32>
    %4 = vector.extract_strided_slice %3 {offsets = [0, 0], sizes = [32, 1], strides = [1, 1]} : vector<32x3xf32> to vector<32x1xf32>
    %5 = vector.extract_strided_slice %3 {offsets = [0, 1], sizes = [32, 1], strides = [1, 1]} : vector<32x3xf32> to vector<32x1xf32>
    %6 = vector.extract_strided_slice %3 {offsets = [0, 2], sizes = [1, 1], strides = [1, 1]} : vector<32x3xf32> to vector<1x1xf32>
    %c0_3 = arith.constant 0 : index
    %c0_4 = arith.constant 0 : index
    %7 = vector.load %arg2[%c0_3, %c0_4] : memref<32x8xf32, #tpu.memory_space<vmem>>, vector<32x8xf32>
    %cst = arith.constant dense<0.000000e+00> : vector<32x128xf32>
    %8 = tpu.matmul %7, %1, %cst {dimension_numbers = #tpu.dot_dimension_numbers<[1], [0], [0], [1], [0, 0, 1, 1], [], []>} : vector<32x8xf32>, vector<8x128xf32>, vector<32x128xf32> -> vector<32x128xf32>
    %9 = vector.broadcast %4 : vector<32x1xf32> to vector<32x128xf32>
    %10 = arith.addf %8, %9 : vector<32x128xf32>
    %cst_5 = arith.constant 0.000000e+00 : f32
    %11 = vector.broadcast %cst_5 : f32 to vector<32x128xf32>
    %12 = arith.maximumf %10, %11 : vector<32x128xf32>
    %c0_6 = arith.constant 0 : index
    %c0_7 = arith.constant 0 : index
    %13 = vector.load %arg3[%c0_6, %c0_7] : memref<32x40xf32, #tpu.memory_space<vmem>>, vector<32x40xf32>
    %14 = vector.extract_strided_slice %13 {offsets = [0, 0], sizes = [32, 32], strides = [1, 1]} : vector<32x40xf32> to vector<32x32xf32>
    %cst_8 = arith.constant dense<0.000000e+00> : vector<32x128xf32>
    %15 = tpu.matmul %14, %12, %cst_8 {dimension_numbers = #tpu.dot_dimension_numbers<[1], [0], [0], [1], [0, 0, 1, 1], [], []>} : vector<32x32xf32>, vector<32x128xf32>, vector<32x128xf32> -> vector<32x128xf32>
    %16 = vector.extract_strided_slice %13 {offsets = [0, 32], sizes = [32, 8], strides = [1, 1]} : vector<32x40xf32> to vector<32x8xf32>
    %cst_9 = arith.constant dense<0.000000e+00> : vector<32x128xf32>
    %17 = tpu.matmul %16, %2, %cst_9 {dimension_numbers = #tpu.dot_dimension_numbers<[1], [0], [0], [1], [0, 0, 1, 1], [], []>} : vector<32x8xf32>, vector<8x128xf32>, vector<32x128xf32> -> vector<32x128xf32>
    %18 = arith.addf %15, %17 : vector<32x128xf32>
    %19 = vector.broadcast %5 : vector<32x1xf32> to vector<32x128xf32>
    %20 = arith.addf %18, %19 : vector<32x128xf32>
    %cst_10 = arith.constant 0.000000e+00 : f32
    %21 = vector.broadcast %cst_10 : f32 to vector<32x128xf32>
    %22 = arith.maximumf %20, %21 : vector<32x128xf32>
    %c0_11 = arith.constant 0 : index
    %c0_12 = arith.constant 0 : index
    %23 = vector.load %arg4[%c0_11, %c0_12] : memref<1x32xf32, #tpu.memory_space<vmem>>, vector<1x32xf32>
    %cst_13 = arith.constant dense<0.000000e+00> : vector<1x128xf32>
    %24 = tpu.matmul %23, %22, %cst_13 {dimension_numbers = #tpu.dot_dimension_numbers<[1], [0], [0], [1], [0, 0, 1, 1], [], []>} : vector<1x32xf32>, vector<32x128xf32>, vector<1x128xf32> -> vector<1x128xf32>
    %25 = vector.broadcast %6 : vector<1x1xf32> to vector<1x128xf32>
    %26 = arith.addf %24, %25 : vector<1x128xf32>
    %c0_14 = arith.constant 0 : index
    %c0_15 = arith.constant 0 : index
    %27 = vector.load %arg6[%c0_14, %c0_15] : memref<1x128xf32, #tpu.memory_space<vmem>>, vector<1x128xf32>
    tpu.vector_store %arg6[%c0_14, %c0_15], %26 {strides = array<i32>} : memref<1x128xf32, #tpu.memory_space<vmem>>, vector<1x128xf32>,
    return
  }
  func.func @transform_0(%arg0: i32) -> (i32, i32) {
    %c0_i32 = arith.constant 0 : i32
    %c0_i32_0 = arith.constant 0 : i32
    return %c0_i32, %arg0 : i32, i32
  }
  func.func @transform_1(%arg0: i32) -> (i32, i32) {
    %c0_i32 = arith.constant 0 : i32
    %c0_i32_0 = arith.constant 0 : i32
    %c0_i32_1 = arith.constant 0 : i32
    return %c0_i32, %c0_i32_0 : i32, i32
  }
  func.func @transform_2(%arg0: i32) -> (i32, i32) {
    %c0_i32 = arith.constant 0 : i32
    %c0_i32_0 = arith.constant 0 : i32
    %c0_i32_1 = arith.constant 0 : i32
    return %c0_i32, %c0_i32_0 : i32, i32
  }
  func.func @transform_3(%arg0: i32) -> (i32, i32) {
    %c0_i32 = arith.constant 0 : i32
    %c0_i32_0 = arith.constant 0 : i32
    %c0_i32_1 = arith.constant 0 : i32
    return %c0_i32, %c0_i32_0 : i32, i32
  }
  func.func @transform_4(%arg0: i32) -> (i32, i32) {
    %c0_i32 = arith.constant 0 : i32
    %c0_i32_0 = arith.constant 0 : i32
    %c0_i32_1 = arith.constant 0 : i32
    return %c0_i32, %c0_i32_0 : i32, i32
  }
  func.func @transform_5(%arg0: i32) -> (i32, i32) {
    %c0_i32 = arith.constant 0 : i32
    %c0_i32_0 = arith.constant 0 : i32
    return %c0_i32, %arg0 : i32, i32
  }
}

</mosaic_0001>

<bundles_post_ra>
// kernel: lr_forward.1
= control target key start
LH: loop header
LB: loop body
LE: loop exit
PB: predicated region body
PF: predicated region fallthrough
CT: control target
= control target key end

     0   :  { %vm50_vm0 = vcmask 64512   ;;  %v551_v3 = vmov 0   ;;  %s552_s15 = smov 96   ;;  %vm261_vm1 = vcmask 261120   ;;  %v553_v15 = vmov 1   ;;  %s653_s0 = inlined_call_operand.vmem [shape: f32[16,128], index: 0, kind: input, shape index: {}]   ;;  %s654_s1 = inlined_call_operand.vmem [shape: f32[32,8], index: 1, kind: input, shape index: {}]   ;;  %s655_s4 = inlined_call_operand.vmem [shape: f32[32,3], index: 4, kind: input, shape index: {}]   ;;  %s656_s2 = inlined_call_operand.vmem [shape: f32[32,40], index: 2, kind: input, shape index: {}]   ;;  %s657_s3 = inlined_call_operand.vmem [shape: f32[1,32], index: 3, kind: input, shape index: {}]   ;;  %s658_s5 = inlined_call_operand.vmem [shape: f32[1,128], index: 5, kind: output, shape index: {}]  }
   0x1   :  { %v20_v0 = vld [vmem:[%s653_s0] sm:$0xff]  ;;  %v27_v2 = vld [vmem:[%s654_s1 + $0x8] sm:$0xff]  ;;  %546 = vset.pattern.permute.xlu1 %v551_v3  ;;  %545 = vset.pattern.permute.xlu0 %v551_v3  ;;  %v28_v4 = vld [vmem:[%s654_s1 + $0x10] sm:$0xff]  ;;  %v554_v36 = vmov 0.0   ;;  %vm555_vm2 = vmmov 0   ;;  %v556_v37 = vmov 2  }
   0x2   :  { %v26_v1 = vld [vmem:[%s654_s1] sm:$0xff]  ;;  %498 = vmatprep.subr.mxu0 %v20_v0  ;;  %v25_v5 = vld [vmem:[%s655_s4 + $0x18] sm:$0xff]  ;;  %v23_v6 = vld [vmem:[%s655_s4 + $0x8] sm:$0xff] }
   0x3   :  { %500 = vmatprep.mubr.msk.f32.mxu0 %vm50_vm0, %v26_v1  ;;  %499 = vmatpush3.msra.mxu0 %v20_v0  ;;  %v24_v7 = vld [vmem:[%s655_s4 + $0x10] sm:$0xff]  ;;  %v29_v8 = vld [vmem:[%s654_s1 + $0x18] sm:$0xff]  ;;  %v617_v9 = vld [vmem:[%s655_s4] sm:$0xff] }
   0x4   :  { %47 = vperm.xlu0 %545, %v25_v5   ;;  %501 = vmatmul.mubr.msk.f32.vlgmr.msra.gmra.mxu0 %vm50_vm0, %v27_v2  ;;  %v152_v10 = vld [vmem:[%s656_s2] sm:$0xff]  ;;  %v153_v11 = vld [vmem:[%s656_s2 + $0x8] sm:$0xff]  ;;  %v154_v12 = vld [vmem:[%s656_s2 + $0x10] sm:$0xff] }
   0x5   :  { %37 = vperm.xlu1 %546, %v23_v6   ;;  %503 = vmatprep.mubr.msk.f32.mxu0 %vm50_vm0, %v28_v4  ;;  %v155_v13 = vld [vmem:[%s656_s2 + $0x18] sm:$0xff]  ;;  %v21_v14 = vld [vmem:[%s653_s0 + $0x8] sm:$0xff]  ;;  %v379_v62 = vld [vmem:[%s657_s3] sm:$0x1] }
   0x6   :  { %506 = vmatprep.subr.mxu1 %v21_v14 }
   0x7   :  { %507 = vmatpush3.msra.mxu1 %v21_v14 }
   0x8   :  { %42 = vperm.xlu0 %545, %v24_v7   ;;  %504 = vmatmul.mubr.msk.f32.gmra.mxu0 %vm50_vm0, %v29_v8 }
   0x9   :  { %32 = vperm.xlu1 %546, %v617_v9   ;;  %522 = vmatprep.mubr.msk.f32.mxu0 %vm261_vm1, %v152_v10 }
   0xa   :  { %528 = vmatprep.subr.mxu1 %v554_v36 }
   0xc   :  { %160 = vrot.lane.b32.xlu0 %v152_v10, %s552_s15 }
   0xd   :  { %162 = vrot.lane.b32.xlu1 %v153_v11, %s552_s15  ;;  %547 = vset.pattern.permute.xlu0 %v553_v15 }
   0xe   :  { %548 = vset.pattern.permute.xlu1 %v553_v15 }
  0x10   :  { %164 = vrot.lane.b32.xlu0 %v154_v12, %s552_s15 }
  0x11   :  { %166 = vrot.lane.b32.xlu1 %v155_v13, %s552_s15 }
  0x14   :  { %368 = vperm.xlu0 %547, %v25_v5  }
  0x15   :  { %364 = vperm.xlu1 %548, %v24_v7  }
  0x18   :  { %356 = vperm.xlu0 %547, %v617_v9  }
  0x19   :  { %360 = vperm.xlu1 %548, %v23_v6  }
  0x1c   :  { %550 = vset.pattern.permute.xlu0 %v556_v37 }
  0x1d   :  { %549 = vset.pattern.permute.xlu1 %v556_v37 }
  0x1e   :  { %381 = vperm.xlu1 %549, %v617_v9  }
  0x7f   :  { %v48_v16 = vpop.permute.xlu0 %47 }
  0x80   :  { %v38_v17 = vpop.permute.xlu1 %37 }
  0x83   :  { %v43_v18 = vpop.permute.xlu0 %42 }
  0x84   :  { %v33_v19 = vpop.permute.xlu1 %32 }
  0x87   :  { %v161_v20 = vpop.permute.xlu0 %160 }
  0x88   :  { %v163_v21 = vpop.permute.xlu1 %162  ;;  %508 = vmatprep.mubr.msk.f32.mxu1 %vm50_vm0, %v161_v20 }
  0x89   :  { %509 = vmatmul.mubr.msk.f32.vlgmr.msra.gmra.mxu1 %vm50_vm0, %v163_v21 }
  0x8b   :  { %v165_v22 = vpop.permute.xlu0 %164 }
  0x8c   :  { %v167_v23 = vpop.permute.xlu1 %166  ;;  %511 = vmatprep.mubr.msk.f32.mxu1 %vm50_vm0, %v165_v22 }
  0x8d   :  { %512 = vmatmul.mubr.msk.f32.gmra.mxu1 %vm50_vm0, %v167_v23 }
  0x8e   :  { %536 = vmatprep.mubr.msk.f32.mxu1 %vm555_vm2, %v554_v36 }
  0x8f   :  { %v369_v42 = vpop.permute.xlu0 %368 }
  0x90   :  { %v365_v40 = vpop.permute.xlu1 %364 }
  0x93   :  { %v357_v54 = vpop.permute.xlu0 %356 }
  0x94   :  { %v361_v47 = vpop.permute.xlu1 %360 }
  0x99   :  { %v382_v63 = vpop.permute.xlu1 %381 }
  0xc4   :  { %v502_v24 = vpop.f32.mrf.mxu0 }
  0xc5   :  { %v135_v29 = vadd.f32 %v502_v24, %v38_v17 }
  0xc6   :  { %v129_v25 = vpop.f32.mrf.mxu0 }
  0xc7   :  { %v130_v32 = vadd.f32 %v129_v25, %v33_v19  ;;  %v149_v34 = vmax.f32 %v135_v29, 0.0 }
  0xc8   :  { %v505_v26 = vpop.f32.mrf.mxu0 }
  0xc9   :  { %v145_v27 = vadd.f32 %v505_v26, %v48_v16  ;;  %v148_v35 = vmax.f32 %v130_v32, 0.0 }
  0xca   :  { %v139_v28 = vpop.f32.mrf.mxu0 }
  0xcb   :  { %v151_v30 = vmax.f32 %v145_v27, 0.0  ;;  %v140_v31 = vadd.f32 %v139_v28, %v43_v18 }
  0xcd   :  { %v150_v33 = vmax.f32 %v140_v31, 0.0  ;;  %514 = vmatprep.subr.mxu0 %v151_v30 }
  0xce   :  { %515 = vmatpush3.msra.mxu0 %v151_v30 }
  0xcf   :  { %516 = vmatprep.subr.mxu0 %v150_v33 }
  0xd0   :  { %517 = vmatpush3.msra.mxu0 %v150_v33 }
  0xd1   :  { %518 = vmatprep.subr.mxu0 %v149_v34 }
  0xd2   :  { %519 = vmatpush3.msra.mxu0 %v149_v34 }
  0xd3   :  { %520 = vmatprep.subr.mxu0 %v148_v35 }
  0xd4   :  { %521 = vmatpush3.msra.mxu0 %v148_v35 }
  0xd5   :  { %523 = vmatmul.mubr.msk.f32.vlgmr.msra.gmra.mxu0 %vm261_vm1, %v153_v11 }
  0xd6   :  { %525 = vmatprep.mubr.msk.f32.mxu0 %vm261_vm1, %v154_v12 }
  0xd9   :  { %526 = vmatmul.mubr.msk.f32.gmra.mxu0 %vm261_vm1, %v155_v13 }
 0x149   :  { %v510_v38 = vpop.f32.mrf.mxu1 }
 0x14b   :  { %v242_v39 = vpop.f32.mrf.mxu1 }
 0x14d   :  { %v513_v43 = vpop.f32.mrf.mxu1 }
 0x14f   :  { %v252_v49 = vpop.f32.mrf.mxu1 }
 0x195   :  { %v524_v41 = vpop.f32.mrf.mxu0 }
 0x196   :  { %v342_v46 = vadd.f32 %v524_v41, %v510_v38 }
 0x197   :  { %v336_v44 = vpop.f32.mrf.mxu0 }
 0x198   :  { %v337_v51 = vadd.f32 %v336_v44, %v242_v39  ;;  %v372_v55 = vadd.f32 %v361_v47, %v342_v46 }
 0x199   :  { %v527_v45 = vpop.f32.mrf.mxu0 }
 0x19a   :  { %v352_v48 = vadd.f32 %v527_v45, %v513_v43  ;;  %v371_v58 = vadd.f32 %v357_v54, %v337_v51  ;;  %v376_v60 = vmax.f32 %v372_v55, 0.0 }
 0x19b   :  { %v346_v50 = vpop.f32.mrf.mxu0 }
 0x19c   :  { %v374_v52 = vadd.f32 %v369_v42, %v352_v48  ;;  %v347_v53 = vadd.f32 %v346_v50, %v252_v49  ;;  %v375_v61 = vmax.f32 %v371_v58, 0.0 }
 0x19e   :  { %v378_v56 = vmax.f32 %v374_v52, 0.0  ;;  %v373_v57 = vadd.f32 %v365_v40, %v347_v53 }
 0x1a0   :  { %v377_v59 = vmax.f32 %v373_v57, 0.0  ;;  %529 = vmatpush3.msra.mxu1 %v378_v56 }
 0x1a1   :  { %530 = vmatprep.subr.mxu1 %v554_v36 }
 0x1a2   :  { %531 = vmatpush3.msra.mxu1 %v377_v59 }
 0x1a3   :  { %532 = vmatprep.subr.mxu1 %v554_v36 }
 0x1a4   :  { %533 = vmatpush3.msra.mxu1 %v376_v60 }
 0x1a5   :  { %534 = vmatprep.subr.mxu1 %v554_v36 }
 0x1a6   :  { %535 = vmatpush3.msra.mxu1 %v375_v61 }
 0x1a7   :  { %537 = vmatmul.mubr.msk.f32.vlgmr.msra.gmra.mxu1 %vm261_vm1, %v379_v62 }
 0x267   :  { %v453_v0 = vpop.f32.mrf.mxu1 }
 0x268   :  { %v454_v1 = vadd.f32 %v453_v0, %v382_v63 }
 0x269   :  { %v538_v2 = vpop.f32.mrf.mxu1 }
 0x26a   :  { %457 = vst [vmem:[%s658_s5] sm:$0x1] %v454_v1 }

</bundles_post_ra>
